<compile_context>
chip_gen: v7x
topology: tpu7x:2x2x1
jax: 0.10.0
libtpu: 0.0.40
codegen_flags: <defaults>
</compile_context>

<pallas_src>
import functools

import jax
import jax.numpy as jnp
from jax import lax
from jax.experimental import pallas as pl
from jax.experimental.pallas import tpu as pltpu

_GELU_A = 0.7978845608028654          # sqrt(2/pi)
_GELU_B = 0.044715 * _GELU_A          # folded: saves one VPU multiply / element


def _gelu_tanh(h):
    # tanh-approx GELU: 0.5*h*(1 + tanh(h*(A + B*h*h)))
    # TODO(synk): PyTorch nn.GELU() default is exact erf; tanh approx differs by ~1e-3.
    hh = h * h
    return 0.5 * h * (1.0 + jnp.tanh(h * (_GELU_A + _GELU_B * hh)))


def _mlp_kernel(x_ref, g_ref, be_ref, w1_ref, b1_ref, w2_ref, b2_ref, o_ref,
                xn_ref, acc_ref, *, epilogue_dtype):
    f = pl.program_id(1)

    @pl.when(f == 0)
    def _():
        # LayerNorm over E (f32), computed once per token tile, cached in MXU dtype.
        x = x_ref[...].astype(jnp.float32)
        mean = jnp.mean(x, axis=-1, keepdims=True)
        xc = x - mean
        var = jnp.mean(xc * xc, axis=-1, keepdims=True)
        xn = xc * lax.rsqrt(var + 1e-5)
        xn = xn * g_ref[...].astype(jnp.float32) + be_ref[...].astype(jnp.float32)
        xn_ref[...] = xn.astype(xn_ref.dtype)
        acc_ref[...] = jnp.zeros_like(acc_ref)

    # ---- Linear 1 chunk (MXU, f32 accumulation) + bias + GELU epilogue ----
    h = jnp.dot(xn_ref[...], w1_ref[...], preferred_element_type=jnp.float32)
    h = h.astype(epilogue_dtype) + b1_ref[...].astype(epilogue_dtype)
    h = _gelu_tanh(h)
    # TODO(synk): nn.Dropout is inference-mode identity here (no in-kernel RNG).

    # ---- Linear 2 chunk (MXU), accumulated over F chunks ----
    acc_ref[...] += jnp.dot(h.astype(w2_ref.dtype), w2_ref[...],
                            preferred_element_type=jnp.float32)

    @pl.when(f == pl.num_programs(1) - 1)
    def _():
        y = acc_ref[...] + b2_ref[...].astype(jnp.float32)
        o_ref[...] = y.astype(o_ref.dtype)


def _pick_tile_m(M, target):
    """MXU-friendly token tile (multiple of 256 -> 128 -> 8), capped so the M
    grid has several steps (feeds both v7x TensorCores)."""
    if M <= 8:
        return 8
    steps = 4 if M >= 32 else 2
    cap = min(target, max(8, -(-M // steps)))
    for align in (256, 128, 8):
        tm = (cap // align) * align
        if tm >= align:
            return tm
    return 8


def _pick_tile_f(F, target):
    """F chunk: whole F when it fits the target, else a 128-aligned divisor."""
    if F <= target:
        return F
    for tf in range(target - target % 128, 127, -128):
        if F % tf == 0:
            return tf
    return F


def _default_epilogue_dtype():
    """bf16 bias+GELU epilogue on chips with packed bf16 VPU/EUP (v6e/v7x)."""
    try:
        kind = jax.devices()[0].device_kind.lower()
    except Exception:
        return jnp.float32
    if "v6" in kind or "v7" in kind:
        return jnp.bfloat16
    return jnp.float32   # v5e and older: no bf16 VPU/EUP


def _vmem_limit_bytes(tm, tf, nf, E, x_bytes, w_bytes, epi_bytes):
    w_bufs = 1 if nf == 1 else 2
    weights = w_bufs * 2 * E * tf * w_bytes           # W1 + W2 chunks
    smalls = 8 * (E + tf) * 4                         # LN params + biases (+ pad slack)
    act_io = 2 * 2 * tm * E * x_bytes                 # x + out tiles, double-buffered
    scratch = tm * E * (w_bytes + 4)                  # xn cache + f32 accumulator
    hidden = tm * tf * (4 + epi_bytes)                # matmul result + epilogue temps
    need = weights + smalls + act_io + scratch + hidden
    # Headroom; clamp to v7x's 64 MiB/TC physical ceiling (valid on all gens).
    return int(min(max(need * 3 // 2 + (4 << 20), 32 << 20), 64 << 20))


def mlp_block(x, gamma, beta, w1, b1, w2, b2, *,
              block_m=256, block_f=2048, mxu_dtype=jnp.bfloat16,
              epilogue_dtype=None):
    """x: (B, S, E); gamma/beta: (E,); w1: (E, F); b1: (F,); w2: (F, E); b2: (E,).
    Returns (B, S, E) == PyTorch MutliLayerPerceptron.forward(x) (eval mode).

    Pass W1/W2 already cast to `mxu_dtype` (bf16) to avoid a per-call HBM cast.
    """
    B, S, E = x.shape
    F = w1.shape[1]
    M = B * S

    if mxu_dtype is not None:
        if w1.dtype != mxu_dtype:
            w1 = w1.astype(mxu_dtype)
        if w2.dtype != mxu_dtype:
            w2 = w2.astype(mxu_dtype)
    if epilogue_dtype is None:
        epilogue_dtype = _default_epilogue_dtype()

    x2 = x.reshape(M, E)
    g2 = gamma.reshape(1, E)
    be2 = beta.reshape(1, E)
    b1_2 = b1.reshape(1, F)
    b2_2 = b2.reshape(1, E)

    tm = _pick_tile_m(M, block_m)
    tf = _pick_tile_f(F, block_f)
    nm = pl.cdiv(M, tm)
    nf = F // tf
    M_pad = nm * tm
    if M_pad != M:
        x2 = jnp.pad(x2, ((0, M_pad - M), (0, 0)))   # padded rows sliced off below

    resident = pl.Buffered(1)                        # constant block index -> 1 buffer
    w_mode = pl.Buffered(1) if nf == 1 else None     # default (2) when streaming F

    kernel = functools.partial(_mlp_kernel, epilogue_dtype=epilogue_dtype)

    out = pl.pallas_call(
        kernel,
        out_shape=jax.ShapeDtypeStruct((M_pad, E), x.dtype),
        grid=(nm, nf),
        in_specs=[
            pl.BlockSpec((tm, E), lambda m, f: (m, 0)),                           # x
            pl.BlockSpec((1, E), lambda m, f: (0, 0), pipeline_mode=resident),    # gamma
            pl.BlockSpec((1, E), lambda m, f: (0, 0), pipeline_mode=resident),    # beta
            pl.BlockSpec((E, tf), lambda m, f: (0, f), pipeline_mode=w_mode),     # W1
            pl.BlockSpec((1, tf), lambda m, f: (0, f), pipeline_mode=w_mode),     # b1
            pl.BlockSpec((tf, E), lambda m, f: (f, 0), pipeline_mode=w_mode),     # W2
            pl.BlockSpec((1, E), lambda m, f: (0, 0), pipeline_mode=resident),    # b2
        ],
        out_specs=pl.BlockSpec((tm, E), lambda m, f: (m, 0)),
        scratch_shapes=[
            pltpu.VMEM((tm, E), w1.dtype),        # cached LayerNorm output (MXU dtype)
            pltpu.VMEM((tm, E), jnp.float32),     # second-matmul accumulator
        ],
        compiler_params=pltpu.CompilerParams(
            dimension_semantics=("parallel", "arbitrary"),
            vmem_limit_bytes=_vmem_limit_bytes(
                tm, tf, nf, E, x.dtype.itemsize, w1.dtype.itemsize,
                jnp.dtype(epilogue_dtype).itemsize),
        ),
    )(x2, g2, be2, w1, b1_2, w2, b2_2)

    return out[:M].reshape(B, S, E)


if __name__ == "__main__":
    # Small, lane-aligned shapes consistent with the module (scaled-down E/F).
    B, S, E, F = 2, 8, 128, 512

    key = jax.random.PRNGKey(0)
    kx, kg, kb, k1, k2, k3, k4 = jax.random.split(key, 7)
    x = jax.random.normal(kx, (B, S, E), dtype=jnp.float32)
    gamma = 1.0 + 0.1 * jax.random.normal(kg, (E,), dtype=jnp.float32)
    beta = 0.1 * jax.random.normal(kb, (E,), dtype=jnp.float32)
    w1 = 0.02 * jax.random.normal(k1, (E, F), dtype=jnp.float32)
    b1 = 0.02 * jax.random.normal(k2, (F,), dtype=jnp.float32)
    w2 = 0.02 * jax.random.normal(k3, (F, E), dtype=jnp.float32)
    b2 = 0.02 * jax.random.normal(k4, (E,), dtype=jnp.float32)

    # Keep MXU weights persistently in bf16 (no per-call HBM cast inside the wrapper).
    w1_bf16 = w1.astype(jnp.bfloat16)
    w2_bf16 = w2.astype(jnp.bfloat16)

    out = mlp_block(x, gamma, beta, w1_bf16, b1, w2_bf16, b2)
    out = jax.block_until_ready(out)

    # Pure-JAX f32 reference (LN eps=1e-5, tanh-approx GELU, eval-mode dropout).
    mean = jnp.mean(x, axis=-1, keepdims=True)
    var = jnp.mean((x - mean) ** 2, axis=-1, keepdims=True)
    xn = (x - mean) * jax.lax.rsqrt(var + 1e-5) * gamma + beta
    h = jnp.einsum("bse,ef->bsf", xn, w1, precision=jax.lax.Precision.HIGHEST) + b1
    h = _gelu_tanh(h)
    ref = jnp.einsum("bsf,fe->bse", h, w2, precision=jax.lax.Precision.HIGHEST) + b2

    assert out.shape == (B, S, E)
    # bf16 MXU operands (f32 accumulation) vs pure-f32 reference -> bf16-level tolerance.
    assert jnp.allclose(out, ref, atol=5e-3, rtol=5e-3), (
        "max abs diff = %f" % float(jnp.max(jnp.abs(out - ref))))
    print("KERNEL_OK")
</pallas_src>

<mosaic_0001>
module attributes {stable_mosaic.version = 11 : i64} {
  func.func @_mlp_kernel(%arg0: i32, %arg1: i32, %arg2: memref<8x128xf32, #tpu.memory_space<vmem>>, %arg3: memref<1x128xf32, #tpu.memory_space<vmem>>, %arg4: memref<1x128xf32, #tpu.memory_space<vmem>>, %arg5: memref<128x512xbf16, #tpu.memory_space<vmem>>, %arg6: memref<1x512xf32, #tpu.memory_space<vmem>>, %arg7: memref<512x128xbf16, #tpu.memory_space<vmem>>, %arg8: memref<1x128xf32, #tpu.memory_space<vmem>>, %arg9: memref<8x128xf32, #tpu.memory_space<vmem>>, %arg10: memref<8x128xbf16, #tpu.memory_space<vmem>>, %arg11: memref<8x128xf32, #tpu.memory_space<vmem>>) attributes {dimension_semantics = [#tpu.dimension_semantics<parallel>, #tpu.dimension_semantics<arbitrary>], iteration_bounds = array<i64: 2, 1>, scalar_prefetch = 0 : i64, scratch_operands = 2 : i64, tpu.core_type = #tpu.core_type<tc>, window_params = [{transform_indices = @transform_0, window_bounds = array<i64: 8, 128>}, {pipeline_mode = #tpu.pipeline_mode<synchronous>, transform_indices = @transform_1, window_bounds = array<i64: 1, 128>}, {pipeline_mode = #tpu.pipeline_mode<synchronous>, transform_indices = @transform_2, window_bounds = array<i64: 1, 128>}, {pipeline_mode = #tpu.pipeline_mode<synchronous>, transform_indices = @transform_3, window_bounds = array<i64: 128, 512>}, {pipeline_mode = #tpu.pipeline_mode<synchronous>, transform_indices = @transform_4, window_bounds = array<i64: 1, 512>}, {pipeline_mode = #tpu.pipeline_mode<synchronous>, transform_indices = @transform_5, window_bounds = array<i64: 512, 128>}, {pipeline_mode = #tpu.pipeline_mode<synchronous>, transform_indices = @transform_6, window_bounds = array<i64: 1, 128>}, {transform_indices = @transform_7, window_bounds = array<i64: 8, 128>}]} {
    %c0_i32 = arith.constant 0 : i32
    %0 = arith.cmpi eq, %arg1, %c0_i32 : i32
    %1 = arith.extui %0 : i1 to i32
    %c0_i32_0 = arith.constant 0 : i32
    %2 = arith.cmpi ne, %1, %c0_i32_0 : i32
    scf.if %2 {
      %c0_19 = arith.constant 0 : index
      %c0_20 = arith.constant 0 : index
      %30 = vector.load %arg2[%c0_19, %c0_20] : memref<8x128xf32, #tpu.memory_space<vmem>>, vector<8x128xf32>
      %cst_21 = arith.constant dense<0.000000e+00> : vector<8xf32>
      %31 = vector.multi_reduction <add>, %30, %cst_21 [1] : vector<8x128xf32> to vector<8xf32>
      %32 = vector.shape_cast %31 : vector<8xf32> to vector<8x1xf32>
      %cst_22 = arith.constant 1.280000e+02 : f32
      %33 = vector.broadcast %cst_22 : f32 to vector<8x1xf32>
      %34 = arith.divf %32, %33 : vector<8x1xf32>
      %35 = vector.broadcast %34 : vector<8x1xf32> to vector<8x128xf32>
      %36 = arith.subf %30, %35 : vector<8x128xf32>
      %37 = arith.mulf %36, %36 : vector<8x128xf32>
      %cst_23 = arith.constant dense<0.000000e+00> : vector<8xf32>
      %38 = vector.multi_reduction <add>, %37, %cst_23 [1] : vector<8x128xf32> to vector<8xf32>
      %39 = vector.shape_cast %38 : vector<8xf32> to vector<8x1xf32>
      %cst_24 = arith.constant 1.280000e+02 : f32
      %40 = vector.broadcast %cst_24 : f32 to vector<8x1xf32>
      %41 = arith.divf %39, %40 : vector<8x1xf32>
      %cst_25 = arith.constant 9.99999974E-6 : f32
      %42 = vector.broadcast %cst_25 : f32 to vector<8x1xf32>
      %43 = arith.addf %41, %42 : vector<8x1xf32>
      %44 = math.rsqrt %43 : vector<8x1xf32>
      %45 = vector.broadcast %44 : vector<8x1xf32> to vector<8x128xf32>
      %46 = arith.mulf %36, %45 : vector<8x128xf32>
      %c0_26 = arith.constant 0 : index
      %c0_27 = arith.constant 0 : index
      %47 = vector.load %arg3[%c0_26, %c0_27] : memref<1x128xf32, #tpu.memory_space<vmem>>, vector<1x128xf32>
      %48 = vector.broadcast %47 : vector<1x128xf32> to vector<8x128xf32>
      %49 = arith.mulf %46, %48 : vector<8x128xf32>
      %c0_28 = arith.constant 0 : index
      %c0_29 = arith.constant 0 : index
      %50 = vector.load %arg4[%c0_28, %c0_29] : memref<1x128xf32, #tpu.memory_space<vmem>>, vector<1x128xf32>
      %51 = vector.broadcast %50 : vector<1x128xf32> to vector<8x128xf32>
      %52 = arith.addf %49, %51 : vector<8x128xf32>
      %53 = arith.truncf %52 : vector<8x128xf32> to vector<8x128xbf16>
      %c0_30 = arith.constant 0 : index
      %c0_31 = arith.constant 0 : index
      %54 = vector.load %arg10[%c0_30, %c0_31] : memref<8x128xbf16, #tpu.memory_space<vmem>>, vector<8x128xbf16>
      tpu.vector_store %arg10[%c0_30, %c0_31], %53 {strides = array<i32>} : memref<8x128xbf16, #tpu.memory_space<vmem>>, vector<8x128xbf16>,
      %cst_32 = arith.constant 0.000000e+00 : f32
      %55 = vector.broadcast %cst_32 : f32 to vector<8x128xf32>
      %c0_33 = arith.constant 0 : index
      %c0_34 = arith.constant 0 : index
      %56 = vector.load %arg11[%c0_33, %c0_34] : memref<8x128xf32, #tpu.memory_space<vmem>>, vector<8x128xf32>
      tpu.vector_store %arg11[%c0_33, %c0_34], %55 {strides = array<i32>} : memref<8x128xf32, #tpu.memory_space<vmem>>, vector<8x128xf32>,
    } else {
    }
    %c0 = arith.constant 0 : index
    %c0_1 = arith.constant 0 : index
    %3 = vector.load %arg10[%c0, %c0_1] : memref<8x128xbf16, #tpu.memory_space<vmem>>, vector<8x128xbf16>
    %c0_2 = arith.constant 0 : index
    %c0_3 = arith.constant 0 : index
    %4 = vector.load %arg5[%c0_2, %c0_3] : memref<128x512xbf16, #tpu.memory_space<vmem>>, vector<128x512xbf16>
    %cst = arith.constant dense<0.000000e+00> : vector<8x512xf32>
    %5 = tpu.matmul %3, %4, %cst {dimension_numbers = #tpu.dot_dimension_numbers<[1], [0], [0], [1], [0, 0, 1, 1], [], []>} : vector<8x128xbf16>, vector<128x512xbf16>, vector<8x512xf32> -> vector<8x512xf32>
    %c0_4 = arith.constant 0 : index
    %c0_5 = arith.constant 0 : index
    %6 = vector.load %arg6[%c0_4, %c0_5] : memref<1x512xf32, #tpu.memory_space<vmem>>, vector<1x512xf32>
    %7 = vector.broadcast %6 : vector<1x512xf32> to vector<8x512xf32>
    %8 = arith.addf %5, %7 : vector<8x512xf32>
    %9 = arith.mulf %8, %8 : vector<8x512xf32>
    %cst_6 = arith.constant 5.000000e-01 : f32
    %10 = vector.broadcast %cst_6 : f32 to vector<8x512xf32>
    %11 = arith.mulf %10, %8 : vector<8x512xf32>
    %cst_7 = arith.constant 0.0356774069 : f32
    %12 = vector.broadcast %cst_7 : f32 to vector<8x512xf32>
    %13 = arith.mulf %12, %9 : vector<8x512xf32>
    %cst_8 = arith.constant 0.797884583 : f32
    %14 = vector.broadcast %cst_8 : f32 to vector<8x512xf32>
    %15 = arith.addf %14, %13 : vector<8x512xf32>
    %16 = arith.mulf %8, %15 : vector<8x512xf32>
    %17 = math.tanh %16 : vector<8x512xf32>
    %cst_9 = arith.constant 1.000000e+00 : f32
    %18 = vector.broadcast %cst_9 : f32 to vector<8x512xf32>
    %19 = arith.addf %18, %17 : vector<8x512xf32>
    %20 = arith.mulf %11, %19 : vector<8x512xf32>
    %c0_10 = arith.constant 0 : index
    %c0_11 = arith.constant 0 : index
    %21 = vector.load %arg11[%c0_10, %c0_11] : memref<8x128xf32, #tpu.memory_space<vmem>>, vector<8x128xf32>
    %22 = arith.truncf %20 : vector<8x512xf32> to vector<8x512xbf16>
    %c0_12 = arith.constant 0 : index
    %c0_13 = arith.constant 0 : index
    %23 = vector.load %arg7[%c0_12, %c0_13] : memref<512x128xbf16, #tpu.memory_space<vmem>>, vector<512x128xbf16>
    %cst_14 = arith.constant dense<0.000000e+00> : vector<8x128xf32>
    %24 = tpu.matmul %22, %23, %cst_14 {dimension_numbers = #tpu.dot_dimension_numbers<[1], [0], [0], [1], [0, 0, 1, 1], [], []>} : vector<8x512xbf16>, vector<512x128xbf16>, vector<8x128xf32> -> vector<8x128xf32>
    %25 = arith.addf %21, %24 : vector<8x128xf32>
    %c0_15 = arith.constant 0 : index
    %c0_16 = arith.constant 0 : index
    %26 = vector.load %arg11[%c0_15, %c0_16] : memref<8x128xf32, #tpu.memory_space<vmem>>, vector<8x128xf32>
    tpu.vector_store %arg11[%c0_15, %c0_16], %25 {strides = array<i32>} : memref<8x128xf32, #tpu.memory_space<vmem>>, vector<8x128xf32>,
    %c0_i32_17 = arith.constant 0 : i32
    %27 = arith.cmpi eq, %arg1, %c0_i32_17 : i32
    %28 = arith.extui %27 : i1 to i32
    %c0_i32_18 = arith.constant 0 : i32
    %29 = arith.cmpi ne, %28, %c0_i32_18 : i32
    scf.if %29 {
      %c0_19 = arith.constant 0 : index
      %c0_20 = arith.constant 0 : index
      %30 = vector.load %arg11[%c0_19, %c0_20] : memref<8x128xf32, #tpu.memory_space<vmem>>, vector<8x128xf32>
      %c0_21 = arith.constant 0 : index
      %c0_22 = arith.constant 0 : index
      %31 = vector.load %arg8[%c0_21, %c0_22] : memref<1x128xf32, #tpu.memory_space<vmem>>, vector<1x128xf32>
      %32 = vector.broadcast %31 : vector<1x128xf32> to vector<8x128xf32>
      %33 = arith.addf %30, %32 : vector<8x128xf32>
      %c0_23 = arith.constant 0 : index
      %c0_24 = arith.constant 0 : index
      %34 = vector.load %arg9[%c0_23, %c0_24] : memref<8x128xf32, #tpu.memory_space<vmem>>, vector<8x128xf32>
      tpu.vector_store %arg9[%c0_23, %c0_24], %33 {strides = array<i32>} : memref<8x128xf32, #tpu.memory_space<vmem>>, vector<8x128xf32>,
    } else {
    }
    return
  }
  func.func @transform_0(%arg0: i32, %arg1: i32) -> (i32, i32) {
    %c0_i32 = arith.constant 0 : i32
    %c0_i32_0 = arith.constant 0 : i32
    return %arg0, %c0_i32 : i32, i32
  }
  func.func @transform_1(%arg0: i32, %arg1: i32) -> (i32, i32) {
    %c0_i32 = arith.constant 0 : i32
    %c0_i32_0 = arith.constant 0 : i32
    %c0_i32_1 = arith.constant 0 : i32
    return %c0_i32, %c0_i32_0 : i32, i32
  }
  func.func @transform_2(%arg0: i32, %arg1: i32) -> (i32, i32) {
    %c0_i32 = arith.constant 0 : i32
    %c0_i32_0 = arith.constant 0 : i32
    %c0_i32_1 = arith.constant 0 : i32
    return %c0_i32, %c0_i32_0 : i32, i32
  }
  func.func @transform_3(%arg0: i32, %arg1: i32) -> (i32, i32) {
    %c0_i32 = arith.constant 0 : i32
    %c0_i32_0 = arith.constant 0 : i32
    return %c0_i32, %arg1 : i32, i32
  }
  func.func @transform_4(%arg0: i32, %arg1: i32) -> (i32, i32) {
    %c0_i32 = arith.constant 0 : i32
    %c0_i32_0 = arith.constant 0 : i32
    return %c0_i32, %arg1 : i32, i32
  }
  func.func @transform_5(%arg0: i32, %arg1: i32) -> (i32, i32) {
    %c0_i32 = arith.constant 0 : i32
    %c0_i32_0 = arith.constant 0 : i32
    return %arg1, %c0_i32 : i32, i32
  }
  func.func @transform_6(%arg0: i32, %arg1: i32) -> (i32, i32) {
    %c0_i32 = arith.constant 0 : i32
    %c0_i32_0 = arith.constant 0 : i32
    %c0_i32_1 = arith.constant 0 : i32
    return %c0_i32, %c0_i32_0 : i32, i32
  }
  func.func @transform_7(%arg0: i32, %arg1: i32) -> (i32, i32) {
    %c0_i32 = arith.constant 0 : i32
    %c0_i32_0 = arith.constant 0 : i32
    return %arg0, %c0_i32 : i32, i32
  }
}

</mosaic_0001>

<bundles_post_ra>
// kernel: tpu_custom_call.1
= control target key start
LH: loop header
LB: loop body
LE: loop exit
PB: predicated region body
PF: predicated region fallthrough
CT: control target
= control target key end

     0   :  { %12 = vsyncpa [#allocation5], 0  ;;  %s2022_s0 = inlined_call_operand.hbm [shape: f32[16,128], index: 0, kind: input, shape index: {}]   ;;  %s2023_s1 = inlined_call_operand.vmem [shape: f32[1,128], index: 1, kind: input, shape index: {}]   ;;  %s2024_s2 = inlined_call_operand.vmem [shape: f32[1,128], index: 2, kind: input, shape index: {}]   ;;  %s2025_s3 = inlined_call_operand.hbm [shape: bf16[128,512], index: 3, kind: input, shape index: {}]   ;;  %s2026_s4 = inlined_call_operand.vmem [shape: f32[1,512], index: 4, kind: input, shape index: {}]   ;;  %s2027_s5 = inlined_call_operand.hbm [shape: bf16[512,128], index: 5, kind: input, shape index: {}]   ;;  %s2028_s6 = inlined_call_operand.vmem [shape: f32[1,128], index: 6, kind: input, shape index: {}]   ;;  %s2029_s7 = inlined_call_operand.hbm [shape: f32[16,128], index: 7, kind: output, shape index: {}]  }
   0x1   :  { %14 = vsyncpa [#allocation5 + $0x1], 0 }
   0x2   :  { %15 = vsyncpa [#allocation8], 0 }
   0x3   :  { %16 = vsyncpa [#allocation6], 0 }
   0x4   :  { %18 = vsyncpa [#allocation6 + $0x1], 0  ;;  %s1751_s24 = smov 0   ;;  %s1753_s25 = smov 0  }
   0x5   :  { %s1755_s26 = smov 0   ;;  %s1757_s27 = smov 0  }
   0x6   :  { %s1759_s28 = smov 0   ;;  %s1761_s29 = smov 0  }
   0x7 LB: > { %2036 = sst [smem:[#allocation14_spill]] %s1680_s24  ;;  %s1221_s30 = sadd.s32 4294967295, %s1700_s29   ;;  %s1700_s29 = sphi %s1761_s29, %s24_s29   ;;  %s1696_s28 = sphi %s1759_s28, %s2057_s28   ;;  %s1692_s27 = sphi %s1757_s27, %s2056_s27   ;;  %s1688_s26 = sphi %s1755_s26, %s2055_s26   ;;  %s1684_s25 = sphi %s1753_s25, %s2054_s25   ;;  %s1680_s24 = sphi %s1751_s24, %s2053_s24  }
   0x8   : > { %s1222_s8 = sadd.s32 4294967294, %s1700_s29   ;;  %p56_p0 = scmp.ne.s32.totalorder %s1684_s25, %s1680_s24 }
   0x9   : > { %p1785_p1 = scmp.eq.s32.totalorder %s1221_s30, 0  ;;  %p1789_p2 = scmp.eq.s32.totalorder %s1221_s30, 1 }
   0xa   : > { %p227_p3 = scmp.eq.s32.totalorder %s1222_s8, 1  ;;  %p1223_p5 = scmp.ge.s32.totalorder %s1700_s29, 1 }
   0xb   : > { %s2037_s9 = scalar_select %p1785_p1, 1, 0 }
   0xc   : > { %p1795_p4 = por %p1785_p1, %p56_p0  ;;  %p1800_p6 = por %p227_p3, %p56_p0 }
   0xd   : > { %p234_p7 = scmp.lt.s32.totalorder %s1700_s29, 3  ;;  %s1702_s14 = smov [#allocation7]  }
   0xe   : > { %s2039_s11 = scalar_select %p1795_p4, 1, 0 }
   0xf   : > { %s2040_s12 = scalar_select %p1800_p6, 1, 0 }
  0x10   : > { %p1805_p8 = pnand %p1223_p5, %p234_p7  ;;  %s255_s15 = sshll.u32 %s1702_s14, 4  ;;  %s1809_s15 = int_to_ptr.vmem [resolvable:$true] %s255_s15 }
  0x11   : > { %2041 = sst [smem:[#allocation15_spill]] %s2040_s12  ;;  %s1703_s17 = smov [#allocation9]  }
  0x12   : > { %p1362_p9 = pneg %p1805_p8  ;;  %s279_s18 = sshll.u32 %s1703_s17, 4  ;;  %s1820_s18 = int_to_ptr.vmem [resolvable:$true] %s279_s18 }
  0x13   : > { %s1528_s21 = scalar_lea.hbm %s2025_s3, 4096 }
  0x14   : > { %p1816_p11 = pnand %p1362_p9, %p1785_p1  ;;  %p1529_p12 = scmp.ne.s32.totalorder %s2025_s3, %s1528_s21 }
  0x15   : > { %p1535_p5 = scmp.lt.u32.totalorder %s1528_s21, %s2025_s3 }
  0x16   : > { %p1530_p13 = pneg %p1816_p11 }
  0x18   : > { %p1531_p0 = pnand %p1530_p13, %p1529_p12 }
  0x1a   : > { %p1532_p3 = pneg %p1531_p0 }
  0x1c   : > { %p1537_p7 = pnand %p1535_p5, %p1532_p3 }
  0x1e   : > { %1540 = shalt.err (!%p1537_p7)
}
  0x1f   : > { %s1541_s14 = scalar_lea.vmem %s1809_s15, 4096  ;;  %p1549_p1 = scmp.lt.s32.totalorder %s1809_s15, %s1809_s15 }
  0x20   : > { %p1542_p9 = scmp.ne.s32.totalorder %s1809_s15, %s1541_s14  ;;  %p1550_p12 = scmp.lt.s32.totalorder %s1541_s14, %s1541_s14 }
  0x22   : > { %p1544_p10 = pnand %p1542_p9, %p1530_p13  ;;  %p1551_p0 = por %p1550_p12, %p1549_p1 }
  0x24   : > { %p1545_p6 = pneg %p1544_p10 }
  0x26   : > { %p1552_p4 = pnand %p1551_p0, %p1545_p6 }
  0x28   : > { %1555 = shalt.err (!%p1552_p4)
}
  0x29   : > { %s1704_s17 = smov 256   ;;  %s1705_s19 = smov 16  }
  0x2a   : > { %1365 = dma.hbm_to_vmem [thread:$0]  (!%p1816_p11), %s2025_s3, 4096, %s1809_s15, [#allocation8], %s1704_s17, %s1704_s17, %s1705_s19  }
  0x2b   : > { %s1556_s30 = scalar_lea.hbm %s2027_s5, 4096 }
  0x2c   : > { %p1557_p1 = scmp.ne.s32.totalorder %s2027_s5, %s1556_s30  ;;  %p1563_p10 = scmp.lt.u32.totalorder %s1556_s30, %s2027_s5 }
  0x2e   : > { %p1559_p4 = pnand %p1557_p1, %p1530_p13 }
  0x30   : > { %p1560_p6 = pneg %p1559_p4 }
  0x32   : > { %p1565_p3 = pnand %p1563_p10, %p1560_p6 }
  0x34   : > { %1568 = shalt.err (!%p1565_p3)
}
  0x35   : > { %s1569_s15 = scalar_lea.vmem %s1820_s18, 4096  ;;  %p1577_p12 = scmp.lt.s32.totalorder %s1820_s18, %s1820_s18 }
  0x36   : > { %p1570_p5 = scmp.ne.s32.totalorder %s1820_s18, %s1569_s15  ;;  %p1578_p0 = scmp.lt.s32.totalorder %s1569_s15, %s1569_s15 }
  0x38   : > { %p1572_p7 = pnand %p1570_p5, %p1530_p13  ;;  %p1579_p1 = por %p1578_p0, %p1577_p12 }
  0x3a   : > { %p1573_p9 = pneg %p1572_p7 }
  0x3c   : > { %p1580_p4 = pnand %p1579_p1, %p1573_p9 }
  0x3e   : > { %1583 = shalt.err (!%p1580_p4)
}
  0x3f   : > { %s1706_s24 = smov 64   ;;  %s1707_s12 = smov 4  }
  0x40   : > { %1368 = dma.hbm_to_vmem [thread:$0]  (!%p1816_p11), %s2027_s5, 4096, %s1820_s18, [#allocation8], %s1706_s24, %s1706_s24, %s1707_s12  }
  0x41   : > { %s36_s20 = sadd.s32 1, %s1696_s28  ;;  %s43_s21 = sadd.s32 1, %s1688_s26 }
  0x42   : > { %p38_p13 = scmp.ge.s32.totalorder %s36_s20, 2  ;;  %p50_p6 = scmp.ne.s32.totalorder %s1688_s26, %s1684_s25 }
  0x43   : > { %p51_p10 = scmp.eq.s32.totalorder %s1700_s29, 0  ;;  %p1379_p3 = scmp.lt.s32.totalorder %s1700_s29, 2 }
  0x44   : > { %s2059_s20 = smov (%p38_p13, %s36_s20), 0  ;;  %p1884_p7 = por %p1789_p2, %p50_p6 }
  0x45   : > { %p52_p5 = por %p51_p10, %p50_p6  ;;  %s40_s16 = ssub.s32 %s1696_s28, %s2059_s20 }
  0x46   : > { %s2044_s22 = scalar_select %p1884_p7, 1, 0 }
  0x47   : > { %s296_s23 = sand.u32 1, %s1688_s26   ;;  %p41_p9 = scmp.eq.s32.totalorder %s40_s16, 0 }
  0x48   : > { %s1228_s18 = sshll.u32 %s296_s23, 3  ;;  %s1229_s30 = sshll.u32 %s1696_s28, 7 }
  0x49   : > { %s1893_s8 = scalar_select %p41_p9, %s1688_s26, %s43_s21  }
  0x4a   : > { %s1898_s24 = scalar_lea.hbm %s2022_s0, %s1229_s30  ;;  %s300_s10 = scalar_lea.vmem [#allocation4], %s1228_s18 }
  0x4b   : > { %s307_s12 = sshll.u32 %s300_s10, 4  ;;  %p1902_p2 = pnand %p1379_p3, %p52_p5  ;;  %s1906_s12 = int_to_ptr.vmem [resolvable:$true] %s307_s12 }
  0x4c   : > { %s297_s19 = scalar_lea.sflag [#allocation5], %s296_s23  ;;  %s1584_s21 = scalar_lea.hbm %s1898_s24, 128 }
  0x4d   : > { %p1585_p11 = scmp.ne.s32.totalorder %s1898_s24, %s1584_s21  ;;  %p1586_p12 = pneg %p1902_p2 }
  0x4e   : > { %s1589_s30 = scalar_lea.hbm %s2022_s0, 256  ;;  %p1590_p4 = scmp.lt.u32.totalorder %s1898_s24, %s2022_s0 }
  0x4f   : > { %p1587_p0 = pnand %p1586_p12, %p1585_p11  ;;  %p1591_p13 = scmp.lt.u32.totalorder %s1589_s30, %s1584_s21 }
  0x50   : > { %p1593_p10 = scmp.lt.u32.totalorder %s1584_s21, %s1898_s24 }
  0x51   : > { %p1588_p1 = pneg %p1587_p0  ;;  %p1592_p6 = por %p1591_p13, %p1590_p4 }
  0x53   : > { %p1594_p3 = por %p1593_p10, %p1592_p6 }
  0x55   : > { %p1595_p5 = pnand %p1594_p3, %p1588_p1 }
  0x57   : > { %1598 = shalt.err (!%p1595_p5)
}
  0x58   : > { %s1599_s23 = scalar_lea.vmem %s1906_s12, 128  ;;  %s1708_s10 = smov [#allocation4]  }
  0x59   : > { %p1600_p9 = scmp.ne.s32.totalorder %s1906_s12, %s1599_s23  ;;  %s1604_s16 = sshll.u32 %s1708_s10, 4  ;;  %s1605_s16 = int_to_ptr.vmem [resolvable:$false] %s1604_s16 }
  0x5a   : > { %s1606_s18 = scalar_lea.vmem %s1605_s16, 256  ;;  %p1607_p7 = scmp.lt.s32.totalorder %s1906_s12, %s1605_s16 }
  0x5b   : > { %p1602_p11 = pnand %p1600_p9, %p1586_p12  ;;  %p1608_p4 = scmp.lt.s32.totalorder %s1606_s18, %s1599_s23 }
  0x5d   : > { %p1603_p0 = pneg %p1602_p11  ;;  %p1609_p13 = por %p1608_p4, %p1607_p7 }
  0x5f   : > { %p1610_p6 = pnand %p1609_p13, %p1603_p0 }
  0x61   : > { %1613 = shalt.err (!%p1610_p6)
}
  0x62   : > { %1372 = dma.hbm_to_vmem [thread:$0]  (!%p1902_p2), %s1898_s24, 128, %s1906_s12, %s297_s19  }
  0x63   : > { %316 = sbr.rel (%p1805_p8) target bundleno = 908 (0x38c), region = 48  ;;  %s1936_s21 = sand.u32 (!%p1805_p8), 1, %s1684_s25  }
  0x64   : > { %s1231_s30 = sshll.u32 (!%p1805_p8), %s1936_s21, 3  ;;  %s319_s14 = scalar_lea.sflag (!%p1805_p8), [#allocation5], %s1936_s21 }
  0x65   : > { %s322_s15 = scalar_lea.vmem (!%p1805_p8), [#allocation4], %s1231_s30  ;;  %p2046_p7 = scmp.ne.s32.totalorder (!%p1805_p8), %s2039_s11, 0 }
  0x6a   : > { %1667 = dma.done.wait (%p2046_p7), %s319_s14, 128  }
  0x6b   : > { %1669 = vsyncadd (%p2046_p7), %s319_s14, 4294967168  ;;  %p2047_p2 = scmp.ne.s32.totalorder %s2037_s9, 0 }
  0x6d   : > { %1671 = dma.done.wait (%p2047_p2), [#allocation8], 8192  }
  0x6e   : > { %1673 = vsyncadd (%p2047_p2), [#allocation8], 4294959104  ;;  %v377_v0 = vld [vmem:[%s322_s15] sm:$0xff]  ;;  %v1709_v37 = vmov 0   ;;  %v1486_v38 = vld [vmem:[#allocation9 + $0x40] sm:$0xff]   ;;  %s1303_s10 = sshll.u32 %s1692_s27, 7 }
  0x6f   : > { %378 = vadd.xlane.f32.xlu0 %v377_v0  ;;  %v1438_v1 = vld [vmem:[#allocation7 + $0x4] ss:$16 sps:$4 sm:$0xff]   ;;  %v1440_v2 = vld [vmem:[#allocation7 + $0xc] ss:$16 sps:$4 sm:$0xff]   ;;  %v1442_v7 = vld [vmem:[#allocation7] ss:$16 sps:$4 sm:$0xff]   ;;  %656 = vmatprep.mubr.bf16.mxu0 %v1709_v37  ;;  %s1973_s9 = scalar_lea.hbm %s2029_s7, %s1303_s10 }
  0x70   : > { %624 = vmatprep.subr.bf16.mxu0 %v1438_v1  ;;  %665 = vmatprep.subr.bf16.mxu1 %v1440_v2  ;;  %v1443_v8 = vld [vmem:[#allocation7 + $0x8] ss:$16 sps:$4 sm:$0xff]   ;;  %v1444_v9 = vld [vmem:[#allocation7 + $0x24] ss:$16 sps:$4 sm:$0xff]   ;;  %v1446_v10 = vld [vmem:[#allocation7 + $0x2c] ss:$16 sps:$4 sm:$0xff]  }
  0x71   : > { %625 = vmatpush1.bf16.msra.mxu0 %v1442_v7  ;;  %666 = vmatpush1.bf16.msra.mxu1 %v1443_v8  ;;  %v1448_v11 = vld [vmem:[#allocation7 + $0x20] ss:$16 sps:$4 sm:$0xff]   ;;  %v1449_v12 = vld [vmem:[#allocation7 + $0x28] ss:$16 sps:$4 sm:$0xff]   ;;  %v1450_v13 = vld [vmem:[#allocation7 + $0x44] ss:$16 sps:$4 sm:$0xff]  }
  0x72   : > { %626 = vmatprep.subr.bf16.mxu0 %v1444_v9  ;;  %667 = vmatprep.subr.bf16.mxu1 %v1446_v10  ;;  %v1452_v14 = vld [vmem:[#allocation7 + $0x4c] ss:$16 sps:$4 sm:$0xff]   ;;  %v1454_v15 = vld [vmem:[#allocation7 + $0x40] ss:$16 sps:$4 sm:$0xff]   ;;  %v1455_v16 = vld [vmem:[#allocation7 + $0x48] ss:$16 sps:$4 sm:$0xff]  }
  0x73   : > { %v1456_v17 = vld [vmem:[#allocation7 + $0x64] ss:$16 sps:$4 sm:$0xff]   ;;  %v1458_v18 = vld [vmem:[#allocation7 + $0x6c] ss:$16 sps:$4 sm:$0xff]   ;;  %v1460_v19 = vld [vmem:[#allocation7 + $0x60] ss:$16 sps:$4 sm:$0xff]   ;;  %697 = vmatprep.mubr.bf16.mxu1 %v1709_v37 }
  0x74   : > { %v1461_v20 = vld [vmem:[#allocation7 + $0x68] ss:$16 sps:$4 sm:$0xff]   ;;  %v1462_v21 = vld [vmem:[#allocation7 + $0x84] ss:$16 sps:$4 sm:$0xff]   ;;  %v1464_v22 = vld [vmem:[#allocation7 + $0x8c] ss:$16 sps:$4 sm:$0xff]  }
  0x75   : > { %627 = vmatpush1.bf16.msra.mxu0 %v1448_v11  ;;  %668 = vmatpush1.bf16.msra.mxu1 %v1449_v12  ;;  %v1466_v23 = vld [vmem:[#allocation7 + $0x80] ss:$16 sps:$4 sm:$0xff]   ;;  %v1467_v24 = vld [vmem:[#allocation7 + $0x88] ss:$16 sps:$4 sm:$0xff]   ;;  %v1468_v25 = vld [vmem:[#allocation7 + $0xa4] ss:$16 sps:$4 sm:$0xff]  }
  0x76   : > { %628 = vmatprep.subr.bf16.mxu0 %v1450_v13  ;;  %669 = vmatprep.subr.bf16.mxu1 %v1452_v14  ;;  %v1470_v26 = vld [vmem:[#allocation7 + $0xac] ss:$16 sps:$4 sm:$0xff]   ;;  %v1472_v27 = vld [vmem:[#allocation7 + $0xa0] ss:$16 sps:$4 sm:$0xff]   ;;  %v1473_v28 = vld [vmem:[#allocation7 + $0xa8] ss:$16 sps:$4 sm:$0xff]  }
  0x77   : > { %v1474_v29 = vld [vmem:[#allocation7 + $0xc4] ss:$16 sps:$4 sm:$0xff]   ;;  %v1476_v30 = vld [vmem:[#allocation7 + $0xcc] ss:$16 sps:$4 sm:$0xff]   ;;  %v1478_v31 = vld [vmem:[#allocation7 + $0xc0] ss:$16 sps:$4 sm:$0xff]  }
  0x78   : > { %v1479_v32 = vld [vmem:[#allocation7 + $0xc8] ss:$16 sps:$4 sm:$0xff]   ;;  %v1480_v33 = vld [vmem:[#allocation7 + $0xe4] ss:$16 sps:$4 sm:$0xff]   ;;  %v1482_v34 = vld [vmem:[#allocation7 + $0xec] ss:$16 sps:$4 sm:$0xff]  }
  0x79   : > { %629 = vmatpush1.bf16.msra.mxu0 %v1454_v15  ;;  %670 = vmatpush1.bf16.msra.mxu1 %v1455_v16  ;;  %v1484_v35 = vld [vmem:[#allocation7 + $0xe0] ss:$16 sps:$4 sm:$0xff]   ;;  %v1485_v36 = vld [vmem:[#allocation7 + $0xe8] ss:$16 sps:$4 sm:$0xff]   ;;  %v1235_v44 = vld [vmem:[%s2023_s1] ss:$0 sm:$0xff] }
  0x7a   : > { %630 = vmatprep.subr.bf16.mxu0 %v1456_v17  ;;  %671 = vmatprep.subr.bf16.mxu1 %v1458_v18  ;;  %v1487_v39 = vld [vmem:[#allocation9 + $0xc0] sm:$0xff]   ;;  %v1236_v46 = vld [vmem:[%s2024_s2] ss:$0 sm:$0xff]  ;;  %v1494_v57 = vld [vmem:[#allocation9 + $0x50] sm:$0xff]   ;;  %v444_v17 = vlaneseq  ;;  %s364_s16 = scalar_lea.vmem [#allocation10], %s1231_s30  ;;  %s1095_s11 = scalar_lea.sflag [#allocation6], %s1936_s21 }
  0x7b   : > { %v1488_v50 = vld [vmem:[#allocation9] sm:$0xff]   ;;  %v1490_v53 = vld [vmem:[#allocation9 + $0x48] sm:$0xff]   ;;  %v1495_v58 = vld [vmem:[#allocation9 + $0xd0] sm:$0xff]   ;;  %s1108_s18 = sshll.u32 %s364_s16, 4  ;;  %p2048_p12 = scmp.ne.s32.totalorder %s2044_s22, 0  ;;  %s1975_s18 = int_to_ptr.vmem [resolvable:$true] %s1108_s18 }
  0x7c   : > { %v1489_v51 = vld [vmem:[#allocation9 + $0x80] sm:$0xff]   ;;  %v1491_v54 = vld [vmem:[#allocation9 + $0xc8] sm:$0xff]   ;;  %v1496_v59 = vld [vmem:[#allocation9 + $0x10] sm:$0xff]   ;;  %v445_v18 = vshrl.u32 %v444_v17, 7  ;;  %s1614_s13 = scalar_lea.vmem %s1975_s18, 128  ;;  %s1710_s27 = smov [#allocation10]  }
  0x7d   : > { %631 = vmatpush1.bf16.msra.mxu0 %v1460_v19  ;;  %672 = vmatpush1.bf16.msra.mxu1 %v1461_v20  ;;  %v1492_v55 = vld [vmem:[#allocation9 + $0x8] sm:$0xff]   ;;  %v1497_v60 = vld [vmem:[#allocation9 + $0x90] sm:$0xff]   ;;  %v1498_v61 = vld [vmem:[#allocation9 + $0x58] sm:$0xff]   ;;  %p1615_p8 = scmp.ne.s32.totalorder %s1975_s18, %s1614_s13  ;;  %s1618_s30 = sshll.u32 %s1710_s27, 4  ;;  %s1619_s30 = int_to_ptr.vmem [resolvable:$false] %s1618_s30 }
  0x7e   : > { %632 = vmatprep.subr.bf16.mxu0 %v1462_v21  ;;  %673 = vmatprep.subr.bf16.mxu1 %v1464_v22  ;;  %v1493_v56 = vld [vmem:[#allocation9 + $0x88] sm:$0xff]   ;;  %v1499_v62 = vld [vmem:[#allocation9 + $0xd8] sm:$0xff]   ;;  %v1502_v1 = vld [vmem:[#allocation9 + $0x60] sm:$0xff]   ;;  %v446_v19 = vsub.s32 0, %v445_v18  ;;  %v454_v20 = vsub.s32 2, %v445_v18  ;;  %v450_v22 = vsub.s32 1, %v445_v18  ;;  %p1621_p3 = scmp.lt.s32.totalorder %s1975_s18, %s1619_s30 }
  0x7f   : > { %v1500_v63 = vld [vmem:[#allocation9 + $0x18] sm:$0xff]   ;;  %v1503_v2 = vld [vmem:[#allocation9 + $0xe0] sm:$0xff]   ;;  %v1508_v7 = vld [vmem:[#allocation9 + $0x28] sm:$0xff]   ;;  %p1616_p1 = pnand %p1615_p8, %p2048_p12  ;;  %s1620_s24 = scalar_lea.vmem %s1619_s30, 256 }
  0x80   : > { %v1509_v8 = vld [vmem:[#allocation9 + $0xa8] sm:$0xff]   ;;  %v1510_v9 = vld [vmem:[#allocation9 + $0x70] sm:$0xff]   ;;  %v1514_v13 = vld [vmem:[#allocation9 + $0x78] sm:$0xff]   ;;  %p1622_p5 = scmp.lt.s32.totalorder %s1620_s24, %s1614_s13 }
  0x81   : > { %633 = vmatpush1.bf16.msra.mxu0 %v1466_v23  ;;  %674 = vmatpush1.bf16.msra.mxu1 %v1467_v24  ;;  %v1511_v10 = vld [vmem:[#allocation9 + $0xf0] sm:$0xff]   ;;  %v1515_v14 = vld [vmem:[#allocation9 + $0xf8] sm:$0xff]   ;;  %v442_v21 = vld [vmem:[%s2026_s4] sm:$0xf]  ;;  %v458_v23 = vsub.s32 3, %v445_v18  ;;  %p1617_p10 = pneg %p1616_p1 }
  0x82   : > { %634 = vmatprep.subr.bf16.mxu0 %v1468_v25  ;;  %675 = vmatprep.subr.bf16.mxu1 %v1470_v26  ;;  %v1512_v11 = vld [vmem:[#allocation9 + $0x30] sm:$0xff]   ;;  %v1516_v15 = vld [vmem:[#allocation9 + $0x38] sm:$0xff]   ;;  %v447_v24 = vrot.slane %v442_v21, %v446_v19  ;;  %v455_v25 = vrot.slane %v442_v21, %v454_v20  ;;  %v451_v26 = vrot.slane %v442_v21, %v450_v22  ;;  %p1623_p9 = por %p1622_p5, %p1621_p3 }
  0x83   : > { %v1513_v12 = vld [vmem:[#allocation9 + $0xb0] sm:$0xff]   ;;  %v1517_v16 = vld [vmem:[#allocation9 + $0xb8] sm:$0xff]  }
  0x84   : > { %p1624_p11 = pnand %p1623_p9, %p1617_p10 }
  0x85   : > { %635 = vmatpush1.bf16.msra.mxu0 %v1472_v27  ;;  %676 = vmatpush1.bf16.msra.mxu1 %v1473_v28  ;;  %v459_v27 = vrot.slane %v442_v21, %v458_v23  ;;  %v1301_v21 = vld [vmem:[%s2028_s6] ss:$0 sm:$0xff] }
  0x86   : > { %636 = vmatprep.subr.bf16.mxu0 %v1474_v29  ;;  %677 = vmatprep.subr.bf16.mxu1 %v1476_v30 }
  0x89   : > { %637 = vmatpush1.bf16.msra.mxu0 %v1478_v31  ;;  %678 = vmatpush1.bf16.msra.mxu1 %v1479_v32 }
  0x8a   : > { %638 = vmatprep.subr.bf16.mxu0 %v1480_v33  ;;  %679 = vmatprep.subr.bf16.mxu1 %v1482_v34 }
  0x8d   : > { %639 = vmatpush1.bf16.msra.mxu0 %v1484_v35  ;;  %680 = vmatpush1.bf16.msra.mxu1 %v1485_v36 }
  0x8e   : > { %1306 = vmatprep.subr.bf16.mxu0 %v1486_v38  ;;  %1328 = vmatprep.subr.bf16.mxu1 %v1487_v39 }
  0xfc   : > { %v379_v3 = vpop.xlane.xlu0 %378 }
  0xfd   : > { %v381_v4 = vmul.f32 0.0078125, %v379_v3  ;;  %v1504_v3 = vld [vmem:[#allocation9 + $0x20] sm:$0xff]  }
  0xff   : > { %v1950_v5 = vsub.f32 %v377_v0, %v381_v4  ;;  %v1501_v0 = vld [vmem:[#allocation9 + $0x98] sm:$0xff]   ;;  %v1505_v4 = vld [vmem:[#allocation9 + $0xa0] sm:$0xff]  }
 0x101   : > { %v383_v6 = vmul.f32 %v1950_v5, %v1950_v5 }
 0x103   : > { %384 = vadd.xlane.f32.xlu0 %v383_v6  ;;  %v1507_v6 = vld [vmem:[#allocation9 + $0xe8] sm:$0xff]  }
 0x190   : > { %v385_v40 = vpop.xlane.xlu0 %384 }
 0x191   : > { %v386_v41 = vmul.f32 0.0078125, %v385_v40 }
 0x193   : > { %v387_v42 = vadd.f32 1e-05, %v386_v41 }
 0x195   : > { %1518 = vrsqrt.f32 %v387_v42 }
 0x19f   : > { %v1519_v43 = vpop.eup %1518 }
 0x1a0   : > { %v389_v45 = vmul.f32 %v1519_v43, %v1950_v5  ;;  %v1506_v5 = vld [vmem:[#allocation9 + $0x68] sm:$0xff]  }
 0x1a2   : > { %v397_v47 = vmul.f32 %v1235_v44, %v389_v45 }
 0x1a4   : > { %v405_v48 = vadd.f32 %v1236_v46, %v397_v47 }
 0x1a6   : > { %v406_v49 = vpack.c.bf16 %v405_v48, %v405_v48 }
 0x1a8   : > { %407 = vst [vmem:[#allocation2] sm:$0xf] %v406_v49 }
 0x1af   : > { %v409_v52 = vld [vmem:[#allocation2] sm:$0xf] }
 0x1b0   : > { %657 = vmatmul.mubr.bf16.vlgmr.msra.gmra.mrb[0].mxu0 %v409_v52  ;;  %698 = vmatmul.mubr.bf16.vlgmr.msra.gmra.mrb[0].mxu1 %v409_v52 }
 0x1b1   : > { %1307 = vmatpush3.bf16.msra.mxu0 %v1488_v50  ;;  %1329 = vmatpush3.bf16.msra.mxu1 %v1489_v51 }
 0x1b2   : > { %1308 = vmatprep.subr.bf16.mxu0 %v1490_v53  ;;  %1330 = vmatprep.subr.bf16.mxu1 %v1491_v54 }
 0x1b5   : > { %1309 = vmatpush3.bf16.msra.mxu0 %v1492_v55  ;;  %1331 = vmatpush3.bf16.msra.mxu1 %v1493_v56 }
 0x1b6   : > { %1310 = vmatprep.subr.bf16.mxu0 %v1494_v57  ;;  %1332 = vmatprep.subr.bf16.mxu1 %v1495_v58 }
 0x1b9   : > { %1311 = vmatpush3.bf16.msra.mxu0 %v1496_v59  ;;  %1333 = vmatpush3.bf16.msra.mxu1 %v1497_v60 }
 0x1ba   : > { %1312 = vmatprep.subr.bf16.mxu0 %v1498_v61  ;;  %1334 = vmatprep.subr.bf16.mxu1 %v1499_v62 }
 0x1bd   : > { %1313 = vmatpush3.bf16.msra.mxu0 %v1500_v63  ;;  %1335 = vmatpush3.bf16.msra.mxu1 %v1501_v0 }
 0x1be   : > { %1314 = vmatprep.subr.bf16.mxu0 %v1502_v1  ;;  %1336 = vmatprep.subr.bf16.mxu1 %v1503_v2 }
 0x1c1   : > { %1315 = vmatpush3.bf16.msra.mxu0 %v1504_v3  ;;  %1337 = vmatpush3.bf16.msra.mxu1 %v1505_v4 }
 0x1c2   : > { %1316 = vmatprep.subr.bf16.mxu0 %v1506_v5  ;;  %1338 = vmatprep.subr.bf16.mxu1 %v1507_v6 }
 0x1c5   : > { %1317 = vmatpush3.bf16.msra.mxu0 %v1508_v7  ;;  %1339 = vmatpush3.bf16.msra.mxu1 %v1509_v8 }
 0x1c6   : > { %1318 = vmatprep.subr.bf16.mxu0 %v1510_v9  ;;  %1340 = vmatprep.subr.bf16.mxu1 %v1511_v10 }
 0x1c9   : > { %1319 = vmatpush3.bf16.msra.mxu0 %v1512_v11  ;;  %1341 = vmatpush3.bf16.msra.mxu1 %v1513_v12 }
 0x1ca   : > { %1320 = vmatprep.subr.bf16.mxu0 %v1514_v13  ;;  %1342 = vmatprep.subr.bf16.mxu1 %v1515_v14 }
 0x1cd   : > { %1321 = vmatpush3.bf16.msra.mxu0 %v1516_v15  ;;  %1343 = vmatpush3.bf16.msra.mxu1 %v1517_v16 }
 0x283   : > { %v658_v28 = vpop.f32.mrb[0].mxu0  ;;  %v699_v29 = vpop.f32.mrb[0].mxu1 }
 0x284   : > { %v659_v30 = vadd.f32 %v658_v28, %v447_v24  ;;  %v700_v31 = vadd.f32 %v699_v29, %v455_v25  ;;  %v660_v32 = vpop.f32.mrb[1].mxu0  ;;  %v701_v33 = vpop.f32.mrb[1].mxu1 }
 0x285   : > { %v661_v34 = vadd.f32 %v660_v32, %v451_v26  ;;  %v702_v35 = vadd.f32 %v701_v33, %v459_v27  ;;  %v662_v36 = vpop.f32.mrb[2].mxu0  ;;  %v703_v37 = vpop.f32.mrb[2].mxu1 }
 0x286   : > { %v706_v38 = vmul.f32 %v659_v30, %v659_v30  ;;  %v708_v39 = vmul.f32 %v700_v31, %v700_v31  ;;  %v663_v40 = vpop.f32.mrb[3].mxu0  ;;  %v704_v41 = vpop.f32.mrb[3].mxu1  ;;  %v710_v60 = vmul.f32 0.5, %v659_v30  ;;  %v712_v63 = vmul.f32 0.5, %v700_v31 }
 0x287   : > { %v707_v42 = vmul.f32 %v661_v34, %v661_v34  ;;  %v709_v43 = vmul.f32 %v702_v35, %v702_v35  ;;  %v711_v0 = vmul.f32 0.5, %v661_v34  ;;  %v713_v3 = vmul.f32 0.5, %v702_v35 }
 0x288   : > { %v714_v44 = vmul.f32 0.035677407, %v706_v38  ;;  %v716_v45 = vmul.f32 0.035677407, %v708_v39 }
 0x289   : > { %v715_v46 = vmul.f32 0.035677407, %v707_v42  ;;  %v717_v47 = vmul.f32 0.035677407, %v709_v43 }
 0x28a   : > { %v718_v48 = vadd.f32 0.7978846, %v714_v44  ;;  %v720_v49 = vadd.f32 0.7978846, %v716_v45 }
 0x28b   : > { %v719_v50 = vadd.f32 0.7978846, %v715_v46  ;;  %v721_v51 = vadd.f32 0.7978846, %v717_v47 }
 0x28c   : > { %v722_v52 = vmul.f32 %v718_v48, %v659_v30  ;;  %v724_v53 = vmul.f32 %v720_v49, %v700_v31 }
 0x28d   : > { %v723_v54 = vmul.f32 %v719_v50, %v661_v34  ;;  %v725_v55 = vmul.f32 %v721_v51, %v702_v35 }
 0x28e   : > { %1520 = vtanh.f32 %v722_v52 }
 0x28f   : > { %1522 = vtanh.f32 %v724_v53 }
 0x290   : > { %1524 = vtanh.f32 %v723_v54 }
 0x291   : > { %1526 = vtanh.f32 %v725_v55 }
 0x298   : > { %v1521_v56 = vpop.eup %1520 }
 0x299   : > { %v1523_v57 = vpop.eup %1522  ;;  %v730_v58 = vadd.f32 1.0, %v1521_v56 }
 0x29a   : > { %v1525_v59 = vpop.eup %1524  ;;  %v732_v61 = vadd.f32 1.0, %v1523_v57 }
 0x29b   : > { %v1527_v62 = vpop.eup %1526  ;;  %v731_v1 = vadd.f32 1.0, %v1525_v59  ;;  %v734_v2 = vmul.f32 %v730_v58, %v710_v60 }
 0x29c   : > { %v733_v4 = vadd.f32 1.0, %v1527_v62  ;;  %v736_v5 = vmul.f32 %v732_v61, %v712_v63 }
 0x29d   : > { %v735_v6 = vmul.f32 %v731_v1, %v711_v0  ;;  %v739_v10 = vpack.c.bf16 %v734_v2, %v734_v2 }
 0x29e   : > { %v737_v7 = vmul.f32 %v733_v4, %v713_v3  ;;  %v741_v11 = vpack.c.bf16 %v736_v5, %v736_v5 }
 0x29f   : > { %v740_v8 = vpack.c.bf16 %v735_v6, %v735_v6 }
 0x2a0   : > { %v742_v9 = vpack.c.bf16 %v737_v7, %v737_v7 }
 0x2a1   : > { %1031 = vmatprep.mubr.bf16.mxu0 %v740_v8 }
 0x2a2   : > { %1071 = vmatprep.mubr.bf16.mxu1 %v742_v9  ;;  %1032 = vmatmul.mubr.bf16.vlgmr.msra.gmra.mrb[4].mxu0 %v739_v10 }
 0x2a3   : > { %1072 = vmatmul.mubr.bf16.vlgmr.msra.gmra.mrb[4].mxu1 %v741_v11 }
 0x375   : > { %v1322_v12 = vpop.f32.mrb[4].mxu0 }
 0x376   : > { %v1344_v13 = vpop.f32.mrb[4].mxu1  ;;  %v1323_v14 = vpop.f32.mrb[5].mxu0 }
 0x377   : > { %v1324_v15 = vadd.f32 %v1323_v14, %v1322_v12  ;;  %v1345_v16 = vpop.f32.mrb[5].mxu1  ;;  %v1325_v17 = vpop.f32.mrb[6].mxu0 }
 0x378   : > { %v1346_v18 = vadd.f32 %v1345_v16, %v1344_v13  ;;  %v1347_v19 = vpop.f32.mrb[6].mxu1  ;;  %v1326_v20 = vpop.f32.mrb[7].mxu0 }
 0x379   : > { %v1348_v22 = vpop.f32.mrb[7].mxu1 }
 0x37a   : > { %v1074_v23 = vadd.f32 %v1346_v18, %v1324_v15 }
 0x37c   : > { %v1092_v24 = vadd.f32 %v1301_v21, %v1074_v23 }
 0x37e   : > { %1093 = vst [vmem:[%s364_s16] sm:$0xff] %v1092_v24 }
 0x37f   : > { %1627 = shalt.err (!%p1624_p11)
}
 0x380   : > { %s1628_s21 = scalar_lea.hbm %s1973_s9, 128  ;;  %s1632_s19 = scalar_lea.hbm %s2029_s7, 256 }
 0x381   : > { %p1629_p0 = scmp.ne.s32.totalorder %s1973_s9, %s1628_s21  ;;  %p1633_p6 = scmp.lt.u32.totalorder %s1973_s9, %s2029_s7 }
 0x382   : > { %p1634_p7 = scmp.lt.u32.totalorder %s1632_s19, %s1628_s21  ;;  %p1636_p8 = scmp.lt.u32.totalorder %s1628_s21, %s1973_s9 }
 0x383   : > { %p1630_p4 = pnand %p1629_p0, %p2048_p12 }
 0x384   : > { %p1635_p2 = por %p1634_p7, %p1633_p6 }
 0x385   : > { %p1631_p13 = pneg %p1630_p4 }
 0x386   : > { %p1637_p1 = por %p1636_p8, %p1635_p2 }
 0x388   : > { %p1638_p10 = pnand %p1637_p1, %p1631_p13 }
 0x38a   : > { %1641 = shalt.err (!%p1638_p10)
}
 0x38b   : > { %1360 = dma.vmem_to_hbm [thread:$0]  (%p2048_p12), %s1975_s18, 128, %s1973_s9, %s1095_s11  }
 0x38c PF: > { %s2049_s16 = sld [smem:[#allocation14_spill]]  ;;  %s2050_s14 = sld [smem:[#allocation15_spill]] }
 0x38d   : > { %p2052_p5 = scmp.ge.s32.totalorder %s1700_s29, 2 }
 0x392   : > { %s1120_s15 = sand.u32 1, %s2049_s16   ;;  %p2051_p3 = scmp.ne.s32.totalorder %s2050_s14, 0 }
 0x393   : > { %s1121_s13 = scalar_lea.sflag [#allocation6], %s1120_s15 }
 0x394   : > { %p1374_p9 = pnand %p2052_p5, %p2051_p3 }
 0x396   : > { %1675 = dma.done.wait (!%p1374_p9), %s1121_s13, 128  }
 0x397   : > { %1677 = vsyncadd (!%p1374_p9), %s1121_s13, 4294967168  ;;  %s24_s29 = sadd.s32 1, %s1700_s29   ;;  %s2053_s24 = smov %s1684_s25 }
 0x398   : > { %p21_p11 = scmp.ge.s32.totalorder %s24_s29, 4   ;;  %s2054_s25 = smov %s1688_s26 }
 0x399   : > { %s2055_s26 = smov %s1893_s8  ;;  %s2056_s27 = smov %s1696_s28 }
 0x39a   : > { %s2057_s28 = smov %s2059_s20  ;;  %23 = sbr.rel (!%p21_p11) target bundleno = 7 (0x7), region = 114 }
 0x3a1   :  { %1126 = vsyncpa [#allocation5], 1 }
 0x3a2   :  { %1128 = vsyncpa [#allocation5 + $0x1], 1 }
 0x3a3   :  { %1129 = vsyncpa [#allocation8], 1 }
 0x3a4   :  { %1130 = vsyncpa [#allocation6], 1 }
 0x3a5   :  { %1132 = vsyncpa [#allocation6 + $0x1], 1 }

</bundles_post_ra>
